<compile_context>
chip_gen: v6e
topology: v6e:2x2x1
jax: 0.10.0
libtpu: 0.0.40
codegen_flags: <defaults>
</compile_context>

<pallas_src>
import jax
import jax.numpy as jnp
from jax import lax
from jax.experimental import pallas as pl
from jax.experimental.pallas import tpu as pltpu

IMAGE_SIZE = 28 * 28      # 784
HIDDEN_SIZE = 256


def discriminator_kernel(x_ref, w1_ref, b1_ref, w2_ref, b2_ref, o_ref):
    # fc1: cast x to bf16 in VMEM (no extra HBM pass), MXU matmul, f32 acc.
    x_bf = x_ref[...].astype(jnp.bfloat16)                        # (TB, 784)
    h = jnp.dot(x_bf, w1_ref[...], preferred_element_type=jnp.float32)
    h = jnp.maximum(h + b1_ref[...], 0.0)                         # (TB, 256) f32
    # fc2: M=1 matmul contracting the hidden dim of both operands.
    #   (1, 256) x (TB, 256) -> (1, TB)  -- already lane-dense for the output.
    logit = lax.dot_general(w2_ref[...], h, (((1,), (1,)), ((), ())),
                            preferred_element_type=jnp.float32)   # (1, TB)
    logit = logit + b2_ref[0]                                     # SMEM scalar bias
    # sigmoid = 1 / (1 + exp(-x)): exp + approx reciprocal on the EUP.
    prob = pl.reciprocal(1.0 + jnp.exp(-logit), approx=True)      # (1, TB) f32
    o_ref[...] = prob.reshape(o_ref.shape)                        # (1, 1, TB)


def _round_up(x, m):
    return (x + m - 1) // m * m


def _choose_tiling(B):
    """Pick (TB, num_tiles): big tiles for DMA efficiency, padding capped at
    <8 rows/tile beyond sublane rounding, and >=2 (even) tiles whenever the
    batch allows so v7x's two TensorCores both get work."""
    B8 = _round_up(B, 8)
    if B8 < 16:
        return B8, 1
    if B8 <= 2048:
        num_tiles = 2                                   # both v7x TCs busy
    else:
        num_tiles = _round_up(-(-B8 // 1024), 2)        # ~1024-row tiles, even count
    TB = _round_up(-(-B8 // num_tiles), 8)
    return TB, num_tiles


def prepare_params(w1, b1, w2, b2):
    """One-time parameter prep, hoisted out of the per-call forward path.
    w1: (784, 256), b1: (256,), w2: (256, 1), b2: (1,)  (transposed vs PyTorch)."""
    w1_bf = w1.astype(jnp.bfloat16)                                # (784, 256)
    b1_row = b1.reshape(1, HIDDEN_SIZE).astype(jnp.float32)        # (1, 256)
    w2_row = w2.reshape(1, HIDDEN_SIZE).astype(jnp.float32)        # (1, 256)
    b2_s = b2.reshape(1).astype(jnp.float32)                       # SMEM scalar
    return w1_bf, b1_row, w2_row, b2_s


def discriminator_forward(x_nchw, params):
    """x_nchw: (B, 1, 28, 28) float32 -> (B, 1) float32 probabilities."""
    w1_bf, b1_row, w2_row, b2_s = params
    B = x_nchw.shape[0]
    x = x_nchw.reshape(B, IMAGE_SIZE).astype(jnp.float32)          # == view(-1, 784)

    TB, num_tiles = _choose_tiling(B)
    B_pad = TB * num_tiles
    if B_pad != B:
        x = jnp.pad(x, ((0, B_pad - B), (0, 0)))                   # rows only; no K pad

    cost = pl.CostEstimate(
        flops=2 * B_pad * IMAGE_SIZE * HIDDEN_SIZE + 4 * B_pad * HIDDEN_SIZE,
        transcendentals=B_pad,
        bytes_accessed=(B_pad * IMAGE_SIZE * 4 + w1_bf.size * 2
                        + b1_row.size * 4 + w2_row.size * 4 + 4 + B_pad * 4),
    )

    out_slab = pl.pallas_call(
        discriminator_kernel,
        out_shape=jax.ShapeDtypeStruct((num_tiles, 1, TB), jnp.float32),
        grid_spec=pltpu.PrefetchScalarGridSpec(
            num_scalar_prefetch=0,
            grid=(num_tiles,),
            in_specs=[
                # x tiles stream f32 (double-buffered); last dim == full array dim.
                pl.BlockSpec((TB, IMAGE_SIZE), lambda i: (i, 0)),
                # Weights / biases stay resident in VMEM across the grid.
                pl.BlockSpec((IMAGE_SIZE, HIDDEN_SIZE), lambda i: (0, 0)),
                pl.BlockSpec((1, HIDDEN_SIZE), lambda i: (0, 0)),
                pl.BlockSpec((1, HIDDEN_SIZE), lambda i: (0, 0)),
                pl.BlockSpec(memory_space=pltpu.MemorySpace.SMEM),
            ],
            out_specs=pl.BlockSpec((1, 1, TB), lambda i: (i, 0, 0)),
        ),
        compiler_params=pltpu.CompilerParams(
            dimension_semantics=("parallel",)),    # shards tiles across v7x TCs
        cost_estimate=cost,
    )(x, w1_bf, b1_row, w2_row, b2_s)

    # Lane-dense slab -> (B, 1), dropping batch padding.
    return out_slab.reshape(B_pad)[:B].reshape(B, 1)


def init_params(key):
    """Deterministic init mimicking nn.Linear's U(-1/sqrt(fan_in), 1/sqrt(fan_in))."""
    k1, k2, k3, k4 = jax.random.split(key, 4)
    bound1 = 1.0 / jnp.sqrt(jnp.float32(IMAGE_SIZE))
    bound2 = 1.0 / jnp.sqrt(jnp.float32(HIDDEN_SIZE))
    # Stored as (in_features, out_features) = transpose of PyTorch weight.
    w1 = jax.random.uniform(k1, (IMAGE_SIZE, HIDDEN_SIZE), jnp.float32,
                            -bound1, bound1)
    b1 = jax.random.uniform(k2, (HIDDEN_SIZE,), jnp.float32, -bound1, bound1)
    w2 = jax.random.uniform(k3, (HIDDEN_SIZE, 1), jnp.float32, -bound2, bound2)
    b2 = jax.random.uniform(k4, (1,), jnp.float32, -bound2, bound2)
    return w1, b1, w2, b2


def _reference(x_nchw, w1, b1, w2, b2):
    xf = x_nchw.reshape(x_nchw.shape[0], IMAGE_SIZE)
    return jax.nn.sigmoid(jnp.maximum(xf @ w1 + b1, 0.0) @ w2 + b2)


if __name__ == "__main__":
    key = jax.random.PRNGKey(0)
    kx, kx2, kp = jax.random.split(key, 3)
    w1, b1, w2, b2 = init_params(kp)
    params = prepare_params(w1, b1, w2, b2)   # one-time prep, reused per call

    # Small demo shape (single tile, padded to 8 rows).
    B = 2
    x = jax.random.normal(kx, (B, 1, 28, 28), jnp.float32)   # NCHW like PyTorch
    out = jax.block_until_ready(discriminator_forward(x, params))
    ref = _reference(x, w1, b1, w2, b2)
    assert out.shape == (B, 1)
    assert jnp.allclose(out, ref, atol=2e-2, rtol=2e-2)       # bf16 matmul inputs

    # Ragged batch exercising the 2-tile / capped-padding path (304, not 512).
    B2 = 300
    x2 = jax.random.normal(kx2, (B2, 1, 28, 28), jnp.float32)
    out2 = jax.block_until_ready(discriminator_forward(x2, params))
    ref2 = _reference(x2, w1, b1, w2, b2)
    assert out2.shape == (B2, 1)
    assert jnp.allclose(out2, ref2, atol=2e-2, rtol=2e-2)

    print("KERNEL_OK")
</pallas_src>

<mosaic_0001>
module attributes {stable_mosaic.version = 11 : i64} {
  func.func @discriminator_kernel(%arg0: i32, %arg1: memref<8x784xf32, #tpu.memory_space<vmem>>, %arg2: memref<784x256xbf16, #tpu.memory_space<vmem>>, %arg3: memref<1x256xf32, #tpu.memory_space<vmem>>, %arg4: memref<1x256xf32, #tpu.memory_space<vmem>>, %arg5: memref<1xf32, #tpu.memory_space<smem>>, %arg6: memref<1x1x8xf32, #tpu.memory_space<vmem>>) attributes {dimension_semantics = [#tpu.dimension_semantics<parallel>], iteration_bounds = array<i64: 1>, scalar_prefetch = 0 : i64, scratch_operands = 0 : i64, tpu.core_type = #tpu.core_type<tc>, window_params = [{transform_indices = @transform_0, window_bounds = array<i64: 8, 784>}, {pipeline_mode = #tpu.pipeline_mode<synchronous>, transform_indices = @transform_1, window_bounds = array<i64: 784, 256>}, {pipeline_mode = #tpu.pipeline_mode<synchronous>, transform_indices = @transform_2, window_bounds = array<i64: 1, 256>}, {pipeline_mode = #tpu.pipeline_mode<synchronous>, transform_indices = @transform_3, window_bounds = array<i64: 1, 256>}, {transform_indices = @transform_4, window_bounds = array<i64: 1>}, {transform_indices = @transform_5, window_bounds = array<i64: 1, 1, 8>}]} {
    %c0 = arith.constant 0 : index
    %c0_0 = arith.constant 0 : index
    %0 = vector.load %arg1[%c0, %c0_0] : memref<8x784xf32, #tpu.memory_space<vmem>>, vector<8x784xf32>
    %1 = arith.truncf %0 : vector<8x784xf32> to vector<8x784xbf16>
    %c0_1 = arith.constant 0 : index
    %c0_2 = arith.constant 0 : index
    %2 = vector.load %arg2[%c0_1, %c0_2] : memref<784x256xbf16, #tpu.memory_space<vmem>>, vector<784x256xbf16>
    %cst = arith.constant dense<0.000000e+00> : vector<8x256xf32>
    %3 = tpu.matmul %1, %2, %cst {dimension_numbers = #tpu.dot_dimension_numbers<[1], [0], [0], [1], [0, 0, 1, 1], [], []>} : vector<8x784xbf16>, vector<784x256xbf16>, vector<8x256xf32> -> vector<8x256xf32>
    %c0_3 = arith.constant 0 : index
    %c0_4 = arith.constant 0 : index
    %4 = vector.load %arg3[%c0_3, %c0_4] : memref<1x256xf32, #tpu.memory_space<vmem>>, vector<1x256xf32>
    %5 = vector.broadcast %4 : vector<1x256xf32> to vector<8x256xf32>
    %6 = arith.addf %3, %5 : vector<8x256xf32>
    %cst_5 = arith.constant 0.000000e+00 : f32
    %7 = vector.broadcast %cst_5 : f32 to vector<8x256xf32>
    %8 = arith.maximumf %6, %7 : vector<8x256xf32>
    %c0_6 = arith.constant 0 : index
    %c0_7 = arith.constant 0 : index
    %9 = vector.load %arg4[%c0_6, %c0_7] : memref<1x256xf32, #tpu.memory_space<vmem>>, vector<1x256xf32>
    %cst_8 = arith.constant dense<0.000000e+00> : vector<1x8xf32>
    %10 = tpu.matmul %9, %8, %cst_8 {dimension_numbers = #tpu.dot_dimension_numbers<[1], [1], [0], [0], [0, 0, 1, 0], [], []>} : vector<1x256xf32>, vector<8x256xf32>, vector<1x8xf32> -> vector<1x8xf32>
    %c0_9 = arith.constant 0 : index
    %11 = memref.load %arg5[%c0_9] : memref<1xf32, #tpu.memory_space<smem>>
    %12 = vector.broadcast %11 : f32 to vector<1x8xf32>
    %13 = arith.addf %10, %12 : vector<1x8xf32>
    %cst_10 = arith.constant 0.000000e+00 : f32
    %14 = vector.broadcast %cst_10 : f32 to vector<1x8xf32>
    %15 = arith.subf %14, %13 : vector<1x8xf32>
    %16 = math.exp %15 : vector<1x8xf32>
    %cst_11 = arith.constant 1.000000e+00 : f32
    %17 = vector.broadcast %cst_11 : f32 to vector<1x8xf32>
    %18 = arith.addf %17, %16 : vector<1x8xf32>
    %19 = tpu.reciprocal %18 {approx = true} : vector<1x8xf32> -> vector<1x8xf32>
    %20 = vector.shape_cast %19 : vector<1x8xf32> to vector<1x1x8xf32>
    %c0_12 = arith.constant 0 : index
    %c0_13 = arith.constant 0 : index
    %c0_14 = arith.constant 0 : index
    %21 = vector.load %arg6[%c0_12, %c0_13, %c0_14] : memref<1x1x8xf32, #tpu.memory_space<vmem>>, vector<1x1x8xf32>
    tpu.vector_store %arg6[%c0_12, %c0_13, %c0_14], %20 {strides = array<i32>} : memref<1x1x8xf32, #tpu.memory_space<vmem>>, vector<1x1x8xf32>,
    return
  }
  func.func @transform_0(%arg0: i32) -> (i32, i32) {
    %c0_i32 = arith.constant 0 : i32
    %c0_i32_0 = arith.constant 0 : i32
    return %arg0, %c0_i32 : i32, i32
  }
  func.func @transform_1(%arg0: i32) -> (i32, i32) {
    %c0_i32 = arith.constant 0 : i32
    %c0_i32_0 = arith.constant 0 : i32
    %c0_i32_1 = arith.constant 0 : i32
    return %c0_i32, %c0_i32_0 : i32, i32
  }
  func.func @transform_2(%arg0: i32) -> (i32, i32) {
    %c0_i32 = arith.constant 0 : i32
    %c0_i32_0 = arith.constant 0 : i32
    %c0_i32_1 = arith.constant 0 : i32
    return %c0_i32, %c0_i32_0 : i32, i32
  }
  func.func @transform_3(%arg0: i32) -> (i32, i32) {
    %c0_i32 = arith.constant 0 : i32
    %c0_i32_0 = arith.constant 0 : i32
    %c0_i32_1 = arith.constant 0 : i32
    return %c0_i32, %c0_i32_0 : i32, i32
  }
  func.func @transform_4(%arg0: i32) -> i32 {
    %c0_i32 = arith.constant 0 : i32
    %c0_i32_0 = arith.constant 0 : i32
    return %c0_i32 : i32
  }
  func.func @transform_5(%arg0: i32) -> (i32, i32, i32) {
    %c0_i32 = arith.constant 0 : i32
    %c0_i32_0 = arith.constant 0 : i32
    %c0_i32_1 = arith.constant 0 : i32
    return %arg0, %c0_i32, %c0_i32_0 : i32, i32, i32
  }
}

</mosaic_0001>

<bundles_post_ra>
// kernel: tpu_custom_call.1
= control target key start
LH: loop header
LB: loop body
LE: loop exit
PB: predicated region body
PF: predicated region fallthrough
CT: control target
= control target key end

     0   :  { %11 = vsyncpa [#allocation4], 0  ;;  %s1316_s0 = inlined_call_operand.hbm [shape: f32[8,784], index: 0, kind: input, shape index: {}]   ;;  %s1317_s1 = inlined_call_operand.hbm [shape: bf16[784,256], index: 1, kind: input, shape index: {}]   ;;  %s1318_s2 = inlined_call_operand.vmem [shape: f32[1,256], index: 2, kind: input, shape index: {}]   ;;  %s1319_s3 = inlined_call_operand.vmem [shape: f32[1,256], index: 3, kind: input, shape index: {}]   ;;  %s1320_s4 = inlined_call_operand.<no memory space> [shape: f32[1], index: 4, kind: input, shape index: {}]   ;;  %s1321_s5 = inlined_call_operand.hbm [shape: f32[1,1,8], index: 5, kind: output, shape index: {}]  }
   0x1   :  { %12 = vsyncpa [#allocation7], 0 }
   0x2   :  { %13 = vsyncpa [#allocation5], 0  ;;  %s1262_s18 = smov [#allocation3]   ;;  %s1263_s20 = smov [#allocation6]  }
   0x3   :  { %s20_s19 = sshll.u32 %s1262_s18, 4  ;;  %s29_s21 = sshll.u32 %s1263_s20, 4  ;;  %s21_s19 = int_to_ptr.vmem [resolvable:$true] %s20_s19  ;;  %s30_s21 = int_to_ptr.vmem [resolvable:$true] %s29_s21 }
   0x4   :  { %s1204_s22 = scalar_lea.vmem %s21_s19, 896  ;;  %p1209_p1 = scmp.lt.s32.totalorder %s21_s19, %s21_s19 }
   0x5   :  { %p1205_p0 = scmp.ne.s32.totalorder %s21_s19, %s1204_s22  ;;  %p1210_p2 = scmp.lt.s32.totalorder %s1204_s22, %s1204_s22 }
   0x7   :  { %p1211_p3 = por %p1210_p2, %p1209_p1 }
   0x9   :  { %p1212_p4 = pnand %p1211_p3, %p1205_p0 }
   0xb   :  { %1215 = shalt.err (!%p1212_p4)
}
   0xc   :  { %23 = dma.hbm_to_vmem [thread:$0]  %s1316_s0, 896, %s21_s19, [#allocation4]  }
   0xd   :  { %s1224_s25 = scalar_lea.vmem %s30_s21, 12544  ;;  %p1229_p6 = scmp.lt.s32.totalorder %s30_s21, %s30_s21 }
   0xe   :  { %p1225_p5 = scmp.ne.s32.totalorder %s30_s21, %s1224_s25  ;;  %p1230_p7 = scmp.lt.s32.totalorder %s1224_s25, %s1224_s25 }
  0x10   :  { %p1231_p8 = por %p1230_p7, %p1229_p6 }
  0x12   :  { %p1232_p9 = pnand %p1231_p8, %p1225_p5 }
  0x14   :  { %1235 = shalt.err (!%p1232_p9)
}
  0x15   :  { %s1264_s26 = smov 128   ;;  %s1265_s27 = smov 8  }
  0x16   :  { %35 = dma.hbm_to_vmem [thread:$0]  %s1317_s1, 12544, %s30_s21, [#allocation7], %s1264_s26, %s1264_s26, %s1265_s27  }
  0x17   :  { %1256 = dma.done.wait [#allocation4], 896  }
  0x18   :  { %1257 = vsyncadd [#allocation4], 4294966400 }
  0x19   :  { %1258 = dma.done.wait [#allocation7], 12544  }
  0x1a   :  { %1259 = vsyncadd [#allocation7], 4294954752  ;;  %v1045_v0 = vld [vmem:[#allocation6 + $0x74] ss:$8 sps:$4 sm:$0xff]   ;;  %v1047_v1 = vld [vmem:[#allocation6 + $0x70] ss:$8 sps:$4 sm:$0xff]  }
  0x1b   :  { %667 = vmatprep.subr.bf16.mxu0 %v1045_v0  ;;  %v1048_v2 = vld [vmem:[#allocation6 + $0x174] ss:$8 sps:$4 sm:$0xff]   ;;  %v1050_v3 = vld [vmem:[#allocation6 + $0x170] ss:$8 sps:$4 sm:$0xff]   ;;  %v1051_v4 = vld [vmem:[#allocation6 + $0x64] ss:$8 sps:$4 sm:$0xff]  }
  0x1c   :  { %668 = vmatpush1.bf16.msra.mxu0 %v1047_v1  ;;  %v1053_v5 = vld [vmem:[#allocation6 + $0x60] ss:$8 sps:$4 sm:$0xff]   ;;  %708 = vmatprep.subr.bf16.mxu1 %v1048_v2  ;;  %v1054_v6 = vld [vmem:[#allocation6 + $0x164] ss:$8 sps:$4 sm:$0xff]   ;;  %v1057_v8 = vld [vmem:[#allocation6 + $0x54] ss:$8 sps:$4 sm:$0xff]  }
  0x1d   :  { %709 = vmatpush1.bf16.msra.mxu1 %v1050_v3  ;;  %669 = vmatprep.subr.bf16.mxu0 %v1051_v4  ;;  %v1056_v7 = vld [vmem:[#allocation6 + $0x160] ss:$8 sps:$4 sm:$0xff]   ;;  %v1059_v9 = vld [vmem:[#allocation6 + $0x50] ss:$8 sps:$4 sm:$0xff]   ;;  %v1060_v10 = vld [vmem:[#allocation6 + $0x154] ss:$8 sps:$4 sm:$0xff]  }
  0x1e   :  { %710 = vmatprep.subr.bf16.mxu1 %v1054_v6  ;;  %v1063_v11 = vld [vmem:[#allocation6 + $0x44] ss:$8 sps:$4 sm:$0xff]   ;;  %v1062_v12 = vld [vmem:[#allocation6 + $0x150] ss:$8 sps:$4 sm:$0xff]   ;;  %v1065_v14 = vld [vmem:[#allocation6 + $0x40] ss:$8 sps:$4 sm:$0xff]  }
  0x1f   :  { %v1066_v13 = vld [vmem:[#allocation6 + $0x144] ss:$8 sps:$4 sm:$0xff]   ;;  %v1069_v15 = vld [vmem:[#allocation6 + $0x34] ss:$8 sps:$4 sm:$0xff]   ;;  %v1068_v16 = vld [vmem:[#allocation6 + $0x140] ss:$8 sps:$4 sm:$0xff]  }
  0x20   :  { %670 = vmatpush1.bf16.msra.mxu0 %v1053_v5  ;;  %v1072_v17 = vld [vmem:[#allocation6 + $0x134] ss:$8 sps:$4 sm:$0xff]   ;;  %v1071_v18 = vld [vmem:[#allocation6 + $0x30] ss:$8 sps:$4 sm:$0xff]   ;;  %v1075_v19 = vld [vmem:[#allocation6 + $0x24] ss:$8 sps:$4 sm:$0xff]  }
  0x21   :  { %671 = vmatprep.subr.bf16.mxu0 %v1057_v8  ;;  %711 = vmatpush1.bf16.msra.mxu1 %v1056_v7  ;;  %v1074_v20 = vld [vmem:[#allocation6 + $0x130] ss:$8 sps:$4 sm:$0xff]   ;;  %v1078_v21 = vld [vmem:[#allocation6 + $0x124] ss:$8 sps:$4 sm:$0xff]   ;;  %v1077_v22 = vld [vmem:[#allocation6 + $0x20] ss:$8 sps:$4 sm:$0xff]  }
  0x22   :  { %712 = vmatprep.subr.bf16.mxu1 %v1060_v10  ;;  %v1081_v23 = vld [vmem:[#allocation6 + $0x14] ss:$8 sps:$4 sm:$0xff]   ;;  %v1080_v24 = vld [vmem:[#allocation6 + $0x120] ss:$8 sps:$4 sm:$0xff]   ;;  %v1083_v26 = vld [vmem:[#allocation6 + $0x10] ss:$8 sps:$4 sm:$0xff]  }
  0x23   :  { %v1084_v25 = vld [vmem:[#allocation6 + $0x114] ss:$8 sps:$4 sm:$0xff]   ;;  %v1087_v27 = vld [vmem:[#allocation6 + $0x4] ss:$8 sps:$4 sm:$0xff]   ;;  %v1086_v28 = vld [vmem:[#allocation6 + $0x110] ss:$8 sps:$4 sm:$0xff]  }
  0x24   :  { %672 = vmatpush1.bf16.msra.mxu0 %v1059_v9  ;;  %v1090_v29 = vld [vmem:[#allocation6 + $0x104] ss:$8 sps:$4 sm:$0xff]   ;;  %v1089_v30 = vld [vmem:[#allocation6] ss:$8 sps:$4 sm:$0xff]   ;;  %v1093_v31 = vld [vmem:[#allocation6 + $0xf4] ss:$8 sps:$4 sm:$0xff]  }
  0x25   :  { %673 = vmatprep.subr.bf16.mxu0 %v1063_v11  ;;  %713 = vmatpush1.bf16.msra.mxu1 %v1062_v12  ;;  %v1092_v32 = vld [vmem:[#allocation6 + $0x100] ss:$8 sps:$4 sm:$0xff]   ;;  %v1096_v33 = vld [vmem:[#allocation6 + $0x1f4] ss:$8 sps:$4 sm:$0xff]   ;;  %v1095_v34 = vld [vmem:[#allocation6 + $0xf0] ss:$8 sps:$4 sm:$0xff]  }
  0x26   :  { %714 = vmatprep.subr.bf16.mxu1 %v1066_v13  ;;  %v1099_v35 = vld [vmem:[#allocation6 + $0xe4] ss:$8 sps:$4 sm:$0xff]   ;;  %v1098_v36 = vld [vmem:[#allocation6 + $0x1f0] ss:$8 sps:$4 sm:$0xff]   ;;  %v1101_v38 = vld [vmem:[#allocation6 + $0xe0] ss:$8 sps:$4 sm:$0xff]  }
  0x27   :  { %v1102_v37 = vld [vmem:[#allocation6 + $0x1e4] ss:$8 sps:$4 sm:$0xff]   ;;  %v1105_v39 = vld [vmem:[#allocation6 + $0xd4] ss:$8 sps:$4 sm:$0xff]   ;;  %v1104_v40 = vld [vmem:[#allocation6 + $0x1e0] ss:$8 sps:$4 sm:$0xff]  }
  0x28   :  { %674 = vmatpush1.bf16.msra.mxu0 %v1065_v14  ;;  %v1108_v41 = vld [vmem:[#allocation6 + $0x1d4] ss:$8 sps:$4 sm:$0xff]   ;;  %v1107_v42 = vld [vmem:[#allocation6 + $0xd0] ss:$8 sps:$4 sm:$0xff]   ;;  %v1111_v43 = vld [vmem:[#allocation6 + $0xc4] ss:$8 sps:$4 sm:$0xff]  }
  0x29   :  { %675 = vmatprep.subr.bf16.mxu0 %v1069_v15  ;;  %715 = vmatpush1.bf16.msra.mxu1 %v1068_v16  ;;  %v1110_v44 = vld [vmem:[#allocation6 + $0x1d0] ss:$8 sps:$4 sm:$0xff]   ;;  %v1114_v45 = vld [vmem:[#allocation6 + $0x1c4] ss:$8 sps:$4 sm:$0xff]   ;;  %v1113_v47 = vld [vmem:[#allocation6 + $0xc0] ss:$8 sps:$4 sm:$0xff]  }
  0x2a   :  { %716 = vmatprep.subr.bf16.mxu1 %v1072_v17  ;;  %v50_v46 = vld [vmem:[#allocation3 + $0x8] sm:$0xff]  ;;  %v52_v50 = vld [vmem:[#allocation3 + $0x18] sm:$0xff]  ;;  %v49_v4 = vld [vmem:[#allocation3] sm:$0xff]  ;;  %v1266_v17 = vmov 0   ;;  %vm663_vm0 = vcmask 130048   ;;  %s1267_s7 = smov [#allocation8]  }
  0x2b   :  { %v57_v48 = vpack.c.bf16 %v50_v46, %v50_v46  ;;  %v1117_v49 = vld [vmem:[#allocation6 + $0xb4] ss:$8 sps:$4 sm:$0xff]   ;;  %v1116_v51 = vld [vmem:[#allocation6 + $0x1c0] ss:$8 sps:$4 sm:$0xff]   ;;  %v59_v52 = vpack.c.bf16 %v52_v50, %v52_v50  ;;  %v1119_v54 = vld [vmem:[#allocation6 + $0xb0] ss:$8 sps:$4 sm:$0xff]   ;;  %v56_v7 = vpack.c.bf16 %v49_v4, %v49_v4 }
  0x2c   :  { %676 = vmatpush1.bf16.msra.mxu0 %v1071_v18  ;;  %v1120_v53 = vld [vmem:[#allocation6 + $0x1b4] ss:$8 sps:$4 sm:$0xff]   ;;  %v1123_v55 = vld [vmem:[#allocation6 + $0xa4] ss:$8 sps:$4 sm:$0xff]   ;;  %v1122_v56 = vld [vmem:[#allocation6 + $0x1b0] ss:$8 sps:$4 sm:$0xff]  }
  0x2d   :  { %677 = vmatprep.subr.bf16.mxu0 %v1075_v19  ;;  %717 = vmatpush1.bf16.msra.mxu1 %v1074_v20  ;;  %v1126_v57 = vld [vmem:[#allocation6 + $0x1a4] ss:$8 sps:$4 sm:$0xff]   ;;  %v1125_v58 = vld [vmem:[#allocation6 + $0xa0] ss:$8 sps:$4 sm:$0xff]   ;;  %v1129_v59 = vld [vmem:[#allocation6 + $0x94] ss:$8 sps:$4 sm:$0xff]  }
  0x2e   :  { %718 = vmatprep.subr.bf16.mxu1 %v1078_v21  ;;  %699 = vmatprep.mubr.bf16.mxu0 %v57_v48  ;;  %v1128_v60 = vld [vmem:[#allocation6 + $0x1a0] ss:$8 sps:$4 sm:$0xff]   ;;  %v1132_v61 = vld [vmem:[#allocation6 + $0x194] ss:$8 sps:$4 sm:$0xff]   ;;  %v1131_v62 = vld [vmem:[#allocation6 + $0x90] ss:$8 sps:$4 sm:$0xff]  }
  0x2f   :  { %740 = vmatprep.mubr.bf16.mxu1 %v59_v52  ;;  %v1135_v63 = vld [vmem:[#allocation6 + $0x84] ss:$8 sps:$4 sm:$0xff]   ;;  %v1134_v0 = vld [vmem:[#allocation6 + $0x190] ss:$8 sps:$4 sm:$0xff]   ;;  %v1137_v1 = vld [vmem:[#allocation6 + $0x80] ss:$8 sps:$4 sm:$0xff]  }
  0x30   :  { %678 = vmatpush1.bf16.msra.mxu0 %v1077_v22  ;;  %v1138_v2 = vld [vmem:[#allocation6 + $0x184] ss:$8 sps:$4 sm:$0xff]   ;;  %v1140_v3 = vld [vmem:[#allocation6 + $0x180] ss:$8 sps:$4 sm:$0xff]   ;;  %v1143_v5 = vld [vmem:[#allocation6 + $0x274] ss:$8 sps:$4 sm:$0xff]  }
  0x31   :  { %679 = vmatprep.subr.bf16.mxu0 %v1081_v23  ;;  %719 = vmatpush1.bf16.msra.mxu1 %v1080_v24  ;;  %v51_v6 = vld [vmem:[#allocation3 + $0x10] sm:$0xff]  ;;  %v1146_v9 = vld [vmem:[#allocation6 + $0x264] ss:$8 sps:$4 sm:$0xff]   ;;  %v1186_v11 = vld [vmem:[#allocation6 + $0x300] ss:$8 sps:$4 sm:$0xff]   ;;  %s930_s8 = sshll.u32 %s1267_s7, 4  ;;  %s931_s8 = int_to_ptr.vmem [resolvable:$true] %s930_s8 }
  0x32   :  { %720 = vmatprep.subr.bf16.mxu1 %v1084_v25  ;;  %v1141_v8 = vld [vmem:[#allocation6 + $0x270] ss:$8 sps:$4 sm:$0xff]   ;;  %v58_v10 = vpack.c.bf16 %v51_v6, %v51_v6  ;;  %v1188_v12 = vld [vmem:[#allocation6 + $0x304] ss:$8 sps:$4 sm:$0xff]   ;;  %v1144_v13 = vld [vmem:[#allocation6 + $0x260] ss:$8 sps:$4 sm:$0xff]   ;;  %p1241_p11 = scmp.lt.s32.totalorder %s931_s8, %s931_s8 }
  0x33   :  { %v54_v14 = vld [vmem:[#allocation3 + $0x28] sm:$0xff]  ;;  %v55_v18 = vld [vmem:[#allocation3 + $0x30] sm:$0xff]  ;;  %v1152_v20 = vld [vmem:[#allocation6 + $0x244] ss:$8 sps:$4 sm:$0xff]   ;;  %vm922_vm1 = vcmask 57344   ;;  %s1236_s9 = scalar_lea.vmem %s931_s8, 16 }
  0x34   :  { %680 = vmatpush1.bf16.msra.mxu0 %v1083_v26  ;;  %v1149_v15 = vld [vmem:[#allocation6 + $0x254] ss:$8 sps:$4 sm:$0xff]   ;;  %v61_v16 = vpack.c.bf16 %v54_v14, %v54_v14  ;;  %v1147_v19 = vld [vmem:[#allocation6 + $0x250] ss:$8 sps:$4 sm:$0xff]   ;;  %v62_v21 = vpack.c.bf16 %v55_v18, %v55_v18  ;;  %v1150_v22 = vld [vmem:[#allocation6 + $0x240] ss:$8 sps:$4 sm:$0xff]   ;;  %p1237_p10 = scmp.ne.s32.totalorder %s931_s8, %s1236_s9 }
  0x35   :  { %681 = vmatprep.subr.bf16.mxu0 %v1087_v27  ;;  %721 = vmatpush1.bf16.msra.mxu1 %v1086_v28  ;;  %v1155_v23 = vld [vmem:[#allocation6 + $0x234] ss:$8 sps:$4 sm:$0xff]   ;;  %v1153_v24 = vld [vmem:[#allocation6 + $0x230] ss:$8 sps:$4 sm:$0xff]   ;;  %v1158_v25 = vld [vmem:[#allocation6 + $0x224] ss:$8 sps:$4 sm:$0xff]  }
  0x36   :  { %722 = vmatprep.subr.bf16.mxu1 %v1090_v29  ;;  %v1156_v26 = vld [vmem:[#allocation6 + $0x220] ss:$8 sps:$4 sm:$0xff]   ;;  %v1161_v27 = vld [vmem:[#allocation6 + $0x214] ss:$8 sps:$4 sm:$0xff]   ;;  %v1159_v28 = vld [vmem:[#allocation6 + $0x210] ss:$8 sps:$4 sm:$0xff]  }
  0x37   :  { %v1164_v29 = vld [vmem:[#allocation6 + $0x204] ss:$8 sps:$4 sm:$0xff]   ;;  %v1189_v46 = vld [vmem:[#allocation6 + $0x280] ss:$8 sps:$4 sm:$0xff]   ;;  %s1240_s10 = scalar_lea.vmem %s931_s8, 32 }
  0x38   :  { %682 = vmatpush1.bf16.msra.mxu0 %v1089_v30  ;;  %v1162_v30 = vld [vmem:[#allocation6 + $0x200] ss:$8 sps:$4 sm:$0xff]   ;;  %p1242_p12 = scmp.lt.s32.totalorder %s1240_s10, %s1236_s9 }
  0x39   :  { %683 = vmatprep.subr.bf16.mxu0 %v1093_v31  ;;  %723 = vmatpush1.bf16.msra.mxu1 %v1092_v32  ;;  %v1167_v31 = vld [vmem:[#allocation6 + $0x2f4] ss:$8 sps:$4 sm:$0xff]   ;;  %v1165_v32 = vld [vmem:[#allocation6 + $0x2f0] ss:$8 sps:$4 sm:$0xff]   ;;  %v833_v52 = vld [vmem:[%s1319_s3] sm:$0x3] }
  0x3a   :  { %724 = vmatprep.subr.bf16.mxu1 %v1096_v33  ;;  %v1170_v33 = vld [vmem:[#allocation6 + $0x2e4] ss:$8 sps:$4 sm:$0xff]   ;;  %p1243_p13 = por %p1242_p12, %p1241_p11 }
  0x3c   :  { %684 = vmatpush2.bf16.msra.mxu0 %v1095_v34  ;;  %v1168_v34 = vld [vmem:[#allocation6 + $0x2e0] ss:$8 sps:$4 sm:$0xff]   ;;  %p1244_p0 = pnand %p1243_p13, %p1237_p10 }
  0x3d   :  { %685 = vmatprep.subr.bf16.mxu0 %v1099_v35  ;;  %725 = vmatpush2.bf16.msra.mxu1 %v1098_v36  ;;  %v1173_v35 = vld [vmem:[#allocation6 + $0x2d4] ss:$8 sps:$4 sm:$0xff]   ;;  %v1171_v36 = vld [vmem:[#allocation6 + $0x2d0] ss:$8 sps:$4 sm:$0xff]  }
  0x3e   :  { %726 = vmatprep.subr.bf16.mxu1 %v1102_v37  ;;  %v1176_v37 = vld [vmem:[#allocation6 + $0x2c4] ss:$8 sps:$4 sm:$0xff]  }
  0x40   :  { %686 = vmatpush2.bf16.msra.mxu0 %v1101_v38  ;;  %v1174_v38 = vld [vmem:[#allocation6 + $0x2c0] ss:$8 sps:$4 sm:$0xff]  }
  0x41   :  { %687 = vmatprep.subr.bf16.mxu0 %v1105_v39  ;;  %727 = vmatpush2.bf16.msra.mxu1 %v1104_v40  ;;  %v1179_v39 = vld [vmem:[#allocation6 + $0x2b4] ss:$8 sps:$4 sm:$0xff]   ;;  %v1177_v40 = vld [vmem:[#allocation6 + $0x2b0] ss:$8 sps:$4 sm:$0xff]  }
  0x42   :  { %728 = vmatprep.subr.bf16.mxu1 %v1108_v41  ;;  %v1182_v41 = vld [vmem:[#allocation6 + $0x2a4] ss:$8 sps:$4 sm:$0xff]  }
  0x44   :  { %688 = vmatpush2.bf16.msra.mxu0 %v1107_v42  ;;  %v1180_v42 = vld [vmem:[#allocation6 + $0x2a0] ss:$8 sps:$4 sm:$0xff]  }
  0x45   :  { %689 = vmatprep.subr.bf16.mxu0 %v1111_v43  ;;  %729 = vmatpush2.bf16.msra.mxu1 %v1110_v44  ;;  %v1185_v43 = vld [vmem:[#allocation6 + $0x294] ss:$8 sps:$4 sm:$0xff]   ;;  %v1183_v44 = vld [vmem:[#allocation6 + $0x290] ss:$8 sps:$4 sm:$0xff]  }
  0x46   :  { %730 = vmatprep.subr.bf16.mxu1 %v1114_v45  ;;  %v1191_v45 = vld [vmem:[#allocation6 + $0x284] ss:$8 sps:$4 sm:$0xff]  }
  0x48   :  { %690 = vmatpush2.bf16.msra.mxu0 %v1113_v47  ;;  %v53_v47 = vld [vmem:[#allocation3 + $0x20] sm:$0xff] }
  0x49   :  { %691 = vmatprep.subr.bf16.mxu0 %v1117_v49  ;;  %731 = vmatpush2.bf16.msra.mxu1 %v1116_v51  ;;  %v60_v48 = vpack.c.bf16 %v53_v47, %v53_v47  ;;  %v163_v49 = vlaneseq }
  0x4a   :  { %732 = vmatprep.subr.bf16.mxu1 %v1120_v53 }
  0x4b   :  { %v164_v50 = vshrl.u32 %v163_v49, 7 }
  0x4c   :  { %692 = vmatpush2.bf16.msra.mxu0 %v1119_v54 }
  0x4d   :  { %693 = vmatprep.subr.bf16.mxu0 %v1123_v55  ;;  %733 = vmatpush2.bf16.msra.mxu1 %v1122_v56  ;;  %v169_v51 = vsub.s32 1, %v164_v50 }
  0x4e   :  { %734 = vmatprep.subr.bf16.mxu1 %v1126_v57 }
  0x4f   :  { %v844_v53 = vrot.slane %v833_v52, %v169_v51 }
  0x50   :  { %694 = vmatpush2.bf16.msra.mxu0 %v1125_v58 }
  0x51   :  { %695 = vmatprep.subr.bf16.mxu0 %v1129_v59  ;;  %735 = vmatpush2.bf16.msra.mxu1 %v1128_v60 }
  0x52   :  { %736 = vmatprep.subr.bf16.mxu1 %v1132_v61 }
  0x54   :  { %696 = vmatpush2.bf16.msra.mxu0 %v1131_v62 }
  0x55   :  { %697 = vmatprep.subr.bf16.mxu0 %v1135_v63  ;;  %737 = vmatpush2.bf16.msra.mxu1 %v1134_v0 }
  0x56   :  { %738 = vmatprep.subr.bf16.mxu1 %v1138_v2  ;;  %v165_v2 = vsub.s32 0, %v164_v50 }
  0x58   :  { %698 = vmatpush2.bf16.msra.mxu0 %v1137_v1 }
  0x59   :  { %749 = vmatprep.subr.bf16.mxu0 %v1143_v5  ;;  %739 = vmatpush2.bf16.msra.mxu1 %v1140_v3  ;;  %v161_v3 = vld [vmem:[%s1318_s2] sm:$0x3] }
  0x5a   :  { %804 = vmatprep.subr.bf16.mxu1 %v1188_v12  ;;  %v166_v4 = vrot.slane %v161_v3, %v165_v2  ;;  %v170_v5 = vrot.slane %v161_v3, %v169_v51 }
  0x5b   :  { %700 = vmatmul.mubr.bf16.vlgmr.msra.gmra.mxu0 %v56_v7 }
  0x5c   :  { %750 = vmatpush1.bf16.msra.mxu0 %v1141_v8  ;;  %741 = vmatmul.mubr.bf16.vlgmr.msra.gmra.mxu1 %v58_v10 }
  0x5d   :  { %751 = vmatprep.subr.bf16.mxu0 %v1146_v9  ;;  %805 = vmatpush1.bf16.msra.mxu1 %v1186_v11 }
  0x5e   :  { %822 = vmatprep.mubr.bf16.mxu1 %v1266_v17  ;;  %781 = vmatprep.mubr.bf16.mxu0 %v61_v16 }
  0x60   :  { %752 = vmatpush1.bf16.msra.mxu0 %v1144_v13 }
  0x61   :  { %753 = vmatprep.subr.bf16.mxu0 %v1149_v15 }
  0x64   :  { %754 = vmatpush1.bf16.msra.mxu0 %v1147_v19  ;;  %1038 = vmatmul.mubr.msk.bf16.vlgmr.msra.gmra.mxu1 %vm663_vm0, %v62_v21  ;;  %v835_v21 = vstv %s1320_s4 }
  0x65   :  { %755 = vmatprep.subr.bf16.mxu0 %v1152_v20  ;;  %911 = vmatprep.mubr.f32.mxu1 %v844_v53  ;;  %v840_v20 = vrot.slane %v833_v52, %v165_v2 }
  0x68   :  { %756 = vmatpush1.bf16.msra.mxu0 %v1150_v22 }
  0x69   :  { %757 = vmatprep.subr.bf16.mxu0 %v1155_v23 }
  0x6c   :  { %758 = vmatpush1.bf16.msra.mxu0 %v1153_v24 }
  0x6d   :  { %759 = vmatprep.subr.bf16.mxu0 %v1158_v25 }
  0x70   :  { %760 = vmatpush1.bf16.msra.mxu0 %v1156_v26 }
  0x71   :  { %761 = vmatprep.subr.bf16.mxu0 %v1161_v27 }
  0x74   :  { %762 = vmatpush1.bf16.msra.mxu0 %v1159_v28 }
  0x75   :  { %763 = vmatprep.subr.bf16.mxu0 %v1164_v29 }
  0x78   :  { %764 = vmatpush1.bf16.msra.mxu0 %v1162_v30 }
  0x79   :  { %765 = vmatprep.subr.bf16.mxu0 %v1167_v31 }
  0x7c   :  { %766 = vmatpush2.bf16.msra.mxu0 %v1165_v32 }
  0x7d   :  { %767 = vmatprep.subr.bf16.mxu0 %v1170_v33 }
  0x80   :  { %768 = vmatpush2.bf16.msra.mxu0 %v1168_v34 }
  0x81   :  { %769 = vmatprep.subr.bf16.mxu0 %v1173_v35 }
  0x84   :  { %770 = vmatpush2.bf16.msra.mxu0 %v1171_v36 }
  0x85   :  { %771 = vmatprep.subr.bf16.mxu0 %v1176_v37 }
  0x88   :  { %772 = vmatpush2.bf16.msra.mxu0 %v1174_v38 }
  0x89   :  { %773 = vmatprep.subr.bf16.mxu0 %v1179_v39 }
  0x8c   :  { %774 = vmatpush2.bf16.msra.mxu0 %v1177_v40 }
  0x8d   :  { %775 = vmatprep.subr.bf16.mxu0 %v1182_v41 }
  0x90   :  { %776 = vmatpush2.bf16.msra.mxu0 %v1180_v42 }
  0x91   :  { %777 = vmatprep.subr.bf16.mxu0 %v1185_v43 }
  0x94   :  { %778 = vmatpush2.bf16.msra.mxu0 %v1183_v44 }
  0x95   :  { %779 = vmatprep.subr.bf16.mxu0 %v1191_v45 }
  0x98   :  { %780 = vmatpush2.bf16.msra.mxu0 %v1189_v46 }
  0x9b   :  { %782 = vmatmul.mubr.bf16.vlgmr.msra.gmra.mxu0 %v60_v48 }
 0x11b   :  { %v701_v54 = vpop.f32.mrf.mxu0 }
 0x11c   :  { %v742_v56 = vpop.f32.mrf.mxu1  ;;  %v702_v6 = vadd.f32 %v701_v54, %v166_v4 }
 0x11d   :  { %v703_v55 = vpop.f32.mrf.mxu0 }
 0x11e   :  { %v744_v58 = vpop.f32.mrf.mxu1  ;;  %v704_v7 = vadd.f32 %v703_v55, %v170_v5  ;;  %v743_v8 = vadd.f32 %v742_v56, %v702_v6 }
 0x11f   :  { %v705_v57 = vpop.f32.mrf.mxu0 }
 0x120   :  { %v746_v60 = vpop.f32.mrf.mxu1  ;;  %v745_v10 = vadd.f32 %v744_v58, %v704_v7 }
 0x121   :  { %v706_v59 = vpop.f32.mrf.mxu0 }
 0x122   :  { %v747_v61 = vpop.f32.mrf.mxu1 }
 0x124   :  { %v824_v62 = vpop.f32.mrf.mxu1 }
 0x126   :  { %v826_v63 = vpop.f32.mrf.mxu1 }
 0x128   :  { %v828_v0 = vpop.f32.mrf.mxu1 }
 0x12a   :  { %v829_v1 = vpop.f32.mrf.mxu1 }
 0x15b   :  { %v783_v9 = vpop.f32.mrf.mxu0 }
 0x15c   :  { %v784_v11 = vadd.f32 %v783_v9, %v743_v8 }
 0x15d   :  { %v785_v12 = vpop.f32.mrf.mxu0 }
 0x15e   :  { %v786_v13 = vadd.f32 %v785_v12, %v745_v10  ;;  %v825_v14 = vadd.f32 %v824_v62, %v784_v11 }
 0x15f   :  { %v787_v15 = vpop.f32.mrf.mxu0 }
 0x160   :  { %v827_v16 = vadd.f32 %v826_v63, %v786_v13  ;;  %v831_v19 = vmax.f32 %v825_v14, 0.0 }
 0x161   :  { %v788_v17 = vpop.f32.mrf.mxu0 }
 0x162   :  { %v832_v18 = vmax.f32 %v827_v16, 0.0 }
 0x164   :  { %877 = vmatprep.subr.mxu1 %v832_v18 }
 0x165   :  { %878 = vmatpush1.xpose.msra.mxu1 %v831_v19 }
 0x168   :  { %912 = vmatmul.mubr.f32.vlgmr.msra.gmra.mxu1 %v840_v20 }
 0x228   :  { %v913_v22 = vpop.f32.mrf.mxu1 }
 0x229   :  { %v914_v23 = vadd.f32 %v913_v22, %v835_v21 }
 0x22a   :  { %v915_v24 = vpop.f32.mrf.mxu1 }
 0x22b   :  { %v917_v25 = vsub.f32 0.0, %v914_v23 }
 0x22d   :  { %v918_v26 = vmul.f32 1.442695, %v917_v25 }
 0x22f   :  { %1192 = vpow2.f32 %v918_v26 }
 0x23c   :  { %v1193_v27 = vpop.eup %1192 }
 0x23d   :  { %v920_v28 = vadd.f32 1.0, %v1193_v27 }
 0x23f   :  { %1194 = vrcp.f32 %v920_v28 }
 0x24c   :  { %v1195_v29 = vpop.eup %1194 }
 0x24d   :  { %923 = vst.msk [vmem:[#allocation8] sm:$0x1] %vm922_vm1, %v1195_v29 }
 0x24e   :  { %1247 = shalt.err (!%p1244_p0)
}
 0x24f   :  { %933 = dma.vmem_to_hbm [thread:$0]  %s931_s8, 16, %s1321_s5, [#allocation5]  }
 0x250   :  { %1260 = dma.done.wait [#allocation5], 16  }
 0x251   :  { %1261 = vsyncadd [#allocation5], 4294967280 }
 0x252   :  { %937 = vsyncpa [#allocation4], 1 }
 0x253   :  { %938 = vsyncpa [#allocation7], 1 }
 0x254   :  { %939 = vsyncpa [#allocation5], 1 }

</bundles_post_ra>
